<compile_context>
chip_gen: v7x
topology: tpu7x:2x2x1
jax: 0.10.0
libtpu: 0.0.40
codegen_flags: <defaults>
</compile_context>

<pallas_src>
import jax
import jax.numpy as jnp
from jax import lax
from jax.experimental import pallas as pl
from jax.experimental.pallas import tpu as pltpu


def _round_up(x: int, m: int) -> int:
    return ((x + m - 1) // m) * m


def _cdiv(a: int, b: int) -> int:
    return (a + b - 1) // b


def _make_postnorm_kernel(d_real: int, d_pad: int, eps: float, matmul_dtype):
    inv_d = 1.0 / float(d_real)
    n_pad = d_pad - d_real

    def kernel(x_ref, w_ref, p_ref, o_ref):
        # x_ref: (tr, Dp) native dtype
        # w_ref: (Dp, Dp) pre-transposed to (in, out) -> plain (M,K)x(K,N) dot
        # p_ref: (8, Dp) f32: row0 = bias, row1 = gamma, row2 = beta
        x = x_ref[...]
        xm = x if matmul_dtype is None else x.astype(matmul_dtype)

        y = jnp.dot(xm, w_ref[...], preferred_element_type=jnp.float32)

        p = p_ref[...]
        bias, gamma, beta = p[0:1, :], p[1:2, :], p[2:3, :]

        # Linear bias + residual (PostNorm: fn(x) + x), in f32.
        y = y + bias + x.astype(jnp.float32)

        # LayerNorm over the *real* D lanes. Padded lanes of y are exactly zero
        # (zero-padded x lanes / W columns / bias), so the plain sum is correct.
        mean = jnp.sum(y, axis=-1, keepdims=True) * inv_d
        centered = y - mean
        sq = jnp.sum(centered * centered, axis=-1, keepdims=True)
        if n_pad:
            # padded lanes of `centered` equal -mean exactly -> exact correction
            sq = sq - float(n_pad) * mean * mean
        var = sq * inv_d
        inv = lax.rsqrt(var + eps)

        out = centered * inv * gamma + beta
        if n_pad:
            out = out[:, :d_real]
        o_ref[...] = out.astype(o_ref.dtype)

    return kernel


def postnorm(x, w, b, gamma, beta, *, eps=1e-5, tile_rows=None,
             use_bf16_matmul=False):
    """PostNorm with fn = Linear(dim, dim).

    x: (batch, seq, dim); w: (dim, dim) in torch Linear layout (out, in);
    b, gamma, beta: (dim,).
    """
    B, S, D = x.shape
    rows = B * S
    dtype = x.dtype
    itemsize = jnp.dtype(dtype).itemsize

    # Lane-dense model dimension; only pad when D is not a multiple of 128.
    Dp = _round_up(D, 128)
    lane_pad = Dp - D

    x2d = x.reshape(rows, D)
    if lane_pad:
        x2d = jnp.pad(x2d, ((0, 0), (0, lane_pad)))

    # torch Linear layout (out, in) -> pre-transpose once to (in, out).
    wt = jnp.swapaxes(w, 0, 1)
    if lane_pad:
        wt = jnp.pad(wt, ((0, lane_pad), (0, lane_pad)))
    matmul_dtype = None
    if use_bf16_matmul and wt.dtype == jnp.float32:
        wt = wt.astype(jnp.bfloat16)            # accuracy-gated MXU fast path
        if dtype == jnp.float32:
            matmul_dtype = jnp.bfloat16
    w_itemsize = jnp.dtype(wt.dtype).itemsize

    # Pack bias / gamma / beta into a single (8, Dp) f32 operand.
    params = jnp.zeros((8, Dp), jnp.float32)
    params = params.at[0, :D].set(b.astype(jnp.float32))
    params = params.at[1, :D].set(gamma.astype(jnp.float32))
    params = params.at[2, :D].set(beta.astype(jnp.float32))

    # ---- row tile sizing --------------------------------------------------
    sublane = {4: 8, 2: 16, 1: 32}.get(itemsize, 8)
    if tile_rows is None:
        tile_rows = 1024 if itemsize <= 2 else 512
    tr = _round_up(max(sublane, min(tile_rows, rows)), sublane)

    # Keep >= 2 grid steps so both v7x TensorCores get work on small inputs.
    if rows > sublane:
        tr = min(tr, _round_up(_cdiv(rows, 2), sublane))

    # Per-generation VMEM budget.
    try:
        vmem_cap = int(pltpu.get_tpu_info().vmem_capacity_bytes)
    except Exception:
        vmem_cap = 64 << 20          # v7x per-TC physical; safe on v5e/v6e too
    budget = int(0.75 * vmem_cap)

    single_buf_consts = hasattr(pl, "Buffered")
    n_const_buf = 1 if single_buf_consts else 2
    resident = n_const_buf * (Dp * Dp * w_itemsize + 8 * Dp * 4)
    per_row = (2 * Dp * itemsize          # x tile, double buffered
               + 2 * D * itemsize         # out tile, double buffered
               + 3 * Dp * 4)              # f32 intermediates headroom
    if budget > resident:
        max_tr = (budget - resident) // per_row
    else:
        max_tr = 0
    if max_tr >= sublane:
        tr = min(tr, (max_tr // sublane) * sublane)
    else:
        # TODO(synk): for very large D the resident weight no longer fits VMEM
        # (notably v7x's 64 MiB); a K-tiled grid axis with an f32 accumulator
        # would be needed here.
        tr = sublane
    tr = max(tr, sublane)

    grid = (_cdiv(rows, tr),)

    # Size the limit assuming 2 const buffers (covers the no-Buffered fallback).
    vmem_limit = 2 * (Dp * Dp * w_itemsize + 8 * Dp * 4) + tr * per_row + (4 << 20)
    vmem_limit = int(min(max(vmem_limit, 16 << 20), vmem_cap))

    kernel = _make_postnorm_kernel(D, Dp, eps, matmul_dtype)

    flops = 2 * rows * Dp * Dp + 10 * rows * Dp
    bytes_accessed = (rows * Dp * itemsize + Dp * Dp * w_itemsize
                      + 8 * Dp * 4 + rows * D * itemsize)
    try:
        cost = pl.CostEstimate(flops=flops, transcendentals=rows,
                               bytes_accessed=bytes_accessed)
    except Exception:
        cost = None

    def build_call(use_single_buffer):
        def const_spec(shape):
            if use_single_buffer:
                return pl.BlockSpec(shape, lambda i: (0, 0),
                                    pipeline_mode=pl.Buffered(1))
            return pl.BlockSpec(shape, lambda i: (0, 0))

        return pl.pallas_call(
            kernel,
            out_shape=jax.ShapeDtypeStruct((rows, D), dtype),
            grid_spec=pltpu.PrefetchScalarGridSpec(
                num_scalar_prefetch=0,
                grid=grid,
                in_specs=[
                    pl.BlockSpec((tr, Dp), lambda i: (i, 0)),   # x tile
                    const_spec((Dp, Dp)),                       # W (resident)
                    const_spec((8, Dp)),                        # packed params
                ],
                out_specs=pl.BlockSpec((tr, D), lambda i: (i, 0)),
            ),
            compiler_params=pltpu.CompilerParams(
                dimension_semantics=("parallel",),
                vmem_limit_bytes=vmem_limit,
            ),
            cost_estimate=cost,
        )

    if single_buf_consts:
        try:
            out2d = build_call(True)(x2d, wt, params)
        except Exception:
            out2d = build_call(False)(x2d, wt, params)
    else:
        out2d = build_call(False)(x2d, wt, params)

    return out2d.reshape(B, S, D)


def postnorm_ref(x, w, b, gamma, beta, eps=1e-5):
    """Pure-JAX reference of LayerNorm(Linear(x) + x)."""
    y = jnp.einsum("bsd,od->bso", x, w) + b
    y = y + x
    mean = jnp.mean(y, axis=-1, keepdims=True)
    var = jnp.mean((y - mean) ** 2, axis=-1, keepdims=True)
    return (y - mean) * lax.rsqrt(var + eps) * gamma + beta


if __name__ == "__main__":
    key = jax.random.PRNGKey(0)
    k_x, k_w, k_b, k_x2, k_w2 = jax.random.split(key, 5)

    # Case 1: small model dim (exercises lane padding 32 -> 128 + exact
    # padded-lane variance correction).
    batch, seq, dim = 2, 8, 32
    x = jax.random.normal(k_x, (batch, seq, dim), dtype=jnp.float32)
    w = jax.random.normal(k_w, (dim, dim), dtype=jnp.float32) * (1.0 / dim ** 0.5)
    b = jax.random.normal(k_b, (dim,), dtype=jnp.float32) * 0.01
    gamma = jnp.ones((dim,), dtype=jnp.float32)    # nn.LayerNorm weight init
    beta = jnp.zeros((dim,), dtype=jnp.float32)    # nn.LayerNorm bias init

    out = jax.block_until_ready(postnorm(x, w, b, gamma, beta))
    ref = postnorm_ref(x, w, b, gamma, beta)
    assert out.shape == (batch, seq, dim)
    assert jnp.allclose(out, ref, atol=1e-4, rtol=1e-4), "mismatch (case 1)"

    # Case 2: lane-aligned dim, row count not a tile multiple
    # (exercises the partial final block: no wrapper padding, no output slice).
    batch2, seq2, dim2 = 3, 7, 128
    x2 = jax.random.normal(k_x2, (batch2, seq2, dim2), dtype=jnp.float32)
    w2 = jax.random.normal(k_w2, (dim2, dim2), dtype=jnp.float32) * (1.0 / dim2 ** 0.5)
    b2 = jnp.zeros((dim2,), dtype=jnp.float32)
    gamma2 = jnp.ones((dim2,), dtype=jnp.float32)
    beta2 = jnp.zeros((dim2,), dtype=jnp.float32)

    out2 = jax.block_until_ready(postnorm(x2, w2, b2, gamma2, beta2))
    ref2 = postnorm_ref(x2, w2, b2, gamma2, beta2)
    assert out2.shape == (batch2, seq2, dim2)
    assert jnp.allclose(out2, ref2, atol=1e-4, rtol=1e-4), "mismatch (case 2)"

    # TODO(synk): `fn` in PostNorm is a generic torch module; only the
    # Linear(dim, dim) instantiation is fused here.
    print("KERNEL_OK")
</pallas_src>

<mosaic_0001>
module attributes {stable_mosaic.version = 11 : i64} {
  func.func @kernel(%arg0: i32, %arg1: memref<8x128xf32, #tpu.memory_space<vmem>>, %arg2: memref<128x128xf32, #tpu.memory_space<vmem>>, %arg3: memref<8x128xf32, #tpu.memory_space<vmem>>, %arg4: memref<8x32xf32, #tpu.memory_space<vmem>>) attributes {dimension_semantics = [#tpu.dimension_semantics<parallel>], iteration_bounds = array<i64: 2>, scalar_prefetch = 0 : i64, scratch_operands = 0 : i64, tpu.core_type = #tpu.core_type<tc>, window_params = [{transform_indices = @transform_0, window_bounds = array<i64: 8, 128>}, {pipeline_mode = #tpu.pipeline_mode<synchronous>, transform_indices = @transform_1, window_bounds = array<i64: 128, 128>}, {pipeline_mode = #tpu.pipeline_mode<synchronous>, transform_indices = @transform_2, window_bounds = array<i64: 8, 128>}, {transform_indices = @transform_3, window_bounds = array<i64: 8, 32>}]} {
    %c0 = arith.constant 0 : index
    %c0_0 = arith.constant 0 : index
    %0 = vector.load %arg1[%c0, %c0_0] : memref<8x128xf32, #tpu.memory_space<vmem>>, vector<8x128xf32>
    %c0_1 = arith.constant 0 : index
    %c0_2 = arith.constant 0 : index
    %1 = vector.load %arg2[%c0_1, %c0_2] : memref<128x128xf32, #tpu.memory_space<vmem>>, vector<128x128xf32>
    %cst = arith.constant dense<0.000000e+00> : vector<8x128xf32>
    %2 = tpu.matmul %0, %1, %cst {dimension_numbers = #tpu.dot_dimension_numbers<[1], [0], [0], [1], [0, 0, 1, 1], [], []>} : vector<8x128xf32>, vector<128x128xf32>, vector<8x128xf32> -> vector<8x128xf32>
    %c0_3 = arith.constant 0 : index
    %c0_4 = arith.constant 0 : index
    %3 = vector.load %arg3[%c0_3, %c0_4] : memref<8x128xf32, #tpu.memory_space<vmem>>, vector<8x128xf32>
    %4 = vector.extract_strided_slice %3 {offsets = [0, 0], sizes = [1, 128], strides = [1, 1]} : vector<8x128xf32> to vector<1x128xf32>
    %5 = vector.extract_strided_slice %3 {offsets = [1, 0], sizes = [1, 128], strides = [1, 1]} : vector<8x128xf32> to vector<1x128xf32>
    %6 = vector.extract_strided_slice %3 {offsets = [2, 0], sizes = [1, 128], strides = [1, 1]} : vector<8x128xf32> to vector<1x128xf32>
    %7 = vector.broadcast %4 : vector<1x128xf32> to vector<8x128xf32>
    %8 = arith.addf %2, %7 : vector<8x128xf32>
    %9 = arith.addf %8, %0 : vector<8x128xf32>
    %cst_5 = arith.constant dense<0.000000e+00> : vector<8xf32>
    %10 = vector.multi_reduction <add>, %9, %cst_5 [1] : vector<8x128xf32> to vector<8xf32>
    %11 = vector.shape_cast %10 : vector<8xf32> to vector<8x1xf32>
    %cst_6 = arith.constant 3.125000e-02 : f32
    %12 = vector.broadcast %cst_6 : f32 to vector<8x1xf32>
    %13 = arith.mulf %11, %12 : vector<8x1xf32>
    %14 = vector.broadcast %13 : vector<8x1xf32> to vector<8x128xf32>
    %15 = arith.subf %9, %14 : vector<8x128xf32>
    %16 = arith.mulf %15, %15 : vector<8x128xf32>
    %cst_7 = arith.constant dense<0.000000e+00> : vector<8xf32>
    %17 = vector.multi_reduction <add>, %16, %cst_7 [1] : vector<8x128xf32> to vector<8xf32>
    %18 = vector.shape_cast %17 : vector<8xf32> to vector<8x1xf32>
    %cst_8 = arith.constant 9.600000e+01 : f32
    %19 = vector.broadcast %cst_8 : f32 to vector<8x1xf32>
    %20 = arith.mulf %19, %13 : vector<8x1xf32>
    %21 = arith.mulf %20, %13 : vector<8x1xf32>
    %22 = arith.subf %18, %21 : vector<8x1xf32>
    %cst_9 = arith.constant 3.125000e-02 : f32
    %23 = vector.broadcast %cst_9 : f32 to vector<8x1xf32>
    %24 = arith.mulf %22, %23 : vector<8x1xf32>
    %cst_10 = arith.constant 9.99999974E-6 : f32
    %25 = vector.broadcast %cst_10 : f32 to vector<8x1xf32>
    %26 = arith.addf %24, %25 : vector<8x1xf32>
    %27 = math.rsqrt %26 : vector<8x1xf32>
    %28 = vector.broadcast %27 : vector<8x1xf32> to vector<8x128xf32>
    %29 = arith.mulf %15, %28 : vector<8x128xf32>
    %30 = vector.broadcast %5 : vector<1x128xf32> to vector<8x128xf32>
    %31 = arith.mulf %29, %30 : vector<8x128xf32>
    %32 = vector.broadcast %6 : vector<1x128xf32> to vector<8x128xf32>
    %33 = arith.addf %31, %32 : vector<8x128xf32>
    %34 = vector.extract_strided_slice %33 {offsets = [0, 0], sizes = [8, 32], strides = [1, 1]} : vector<8x128xf32> to vector<8x32xf32>
    %c0_11 = arith.constant 0 : index
    %c0_12 = arith.constant 0 : index
    %35 = vector.load %arg4[%c0_11, %c0_12] : memref<8x32xf32, #tpu.memory_space<vmem>>, vector<8x32xf32>
    tpu.vector_store %arg4[%c0_11, %c0_12], %34 {strides = array<i32>} : memref<8x32xf32, #tpu.memory_space<vmem>>, vector<8x32xf32>,
    return
  }
  func.func @transform_0(%arg0: i32) -> (i32, i32) {
    %c0_i32 = arith.constant 0 : i32
    %c0_i32_0 = arith.constant 0 : i32
    return %arg0, %c0_i32 : i32, i32
  }
  func.func @transform_1(%arg0: i32) -> (i32, i32) {
    %c0_i32 = arith.constant 0 : i32
    %c0_i32_0 = arith.constant 0 : i32
    %c0_i32_1 = arith.constant 0 : i32
    return %c0_i32, %c0_i32_0 : i32, i32
  }
  func.func @transform_2(%arg0: i32) -> (i32, i32) {
    %c0_i32 = arith.constant 0 : i32
    %c0_i32_0 = arith.constant 0 : i32
    %c0_i32_1 = arith.constant 0 : i32
    return %c0_i32, %c0_i32_0 : i32, i32
  }
  func.func @transform_3(%arg0: i32) -> (i32, i32) {
    %c0_i32 = arith.constant 0 : i32
    %c0_i32_0 = arith.constant 0 : i32
    return %arg0, %c0_i32 : i32, i32
  }
}

module attributes {stable_mosaic.version = 11 : i64} {
  func.func @kernel(%arg0: i32, %arg1: memref<8x128xf32, #tpu.memory_space<vmem>>, %arg2: memref<128x128xf32, #tpu.memory_space<vmem>>, %arg3: memref<8x128xf32, #tpu.memory_space<vmem>>, %arg4: memref<8x32xf32, #tpu.memory_space<vmem>>) attributes {dimension_semantics = [#tpu.dimension_semantics<parallel>], iteration_bounds = array<i64: 2>, scalar_prefetch = 0 : i64, scratch_operands = 0 : i64, tpu.core_type = #tpu.core_type<tc>, window_params = [{transform_indices = @transform_0, window_bounds = array<i64: 8, 128>}, {pipeline_mode = #tpu.pipeline_mode<synchronous>, transform_indices = @transform_1, window_bounds = array<i64: 128, 128>}, {pipeline_mode = #tpu.pipeline_mode<synchronous>, transform_indices = @transform_2, window_bounds = array<i64: 8, 128>}, {transform_indices = @transform_3, window_bounds = array<i64: 8, 32>}]} {
    %c0 = arith.constant 0 : index
    %c0_0 = arith.constant 0 : index
    %0 = vector.load %arg1[%c0, %c0_0] : memref<8x128xf32, #tpu.memory_space<vmem>>, vector<8x128xf32>
    %c0_1 = arith.constant 0 : index
    %c0_2 = arith.constant 0 : index
    %1 = vector.load %arg2[%c0_1, %c0_2] : memref<128x128xf32, #tpu.memory_space<vmem>>, vector<128x128xf32>
    %cst = arith.constant dense<0.000000e+00> : vector<8x128xf32>
    %2 = tpu.matmul %0, %1, %cst {dimension_numbers = #tpu.dot_dimension_numbers<[1], [0], [0], [1], [0, 0, 1, 1], [], []>} : vector<8x128xf32>, vector<128x128xf32>, vector<8x128xf32> -> vector<8x128xf32>
    %c0_3 = arith.constant 0 : index
    %c0_4 = arith.constant 0 : index
    %3 = vector.load %arg3[%c0_3, %c0_4] : memref<8x128xf32, #tpu.memory_space<vmem>>, vector<8x128xf32>
    %4 = vector.extract_strided_slice %3 {offsets = [0, 0], sizes = [1, 128], strides = [1, 1]} : vector<8x128xf32> to vector<1x128xf32>
    %5 = vector.extract_strided_slice %3 {offsets = [1, 0], sizes = [1, 128], strides = [1, 1]} : vector<8x128xf32> to vector<1x128xf32>
    %6 = vector.extract_strided_slice %3 {offsets = [2, 0], sizes = [1, 128], strides = [1, 1]} : vector<8x128xf32> to vector<1x128xf32>
    %7 = vector.broadcast %4 : vector<1x128xf32> to vector<8x128xf32>
    %8 = arith.addf %2, %7 : vector<8x128xf32>
    %9 = arith.addf %8, %0 : vector<8x128xf32>
    %cst_5 = arith.constant dense<0.000000e+00> : vector<8xf32>
    %10 = vector.multi_reduction <add>, %9, %cst_5 [1] : vector<8x128xf32> to vector<8xf32>
    %11 = vector.shape_cast %10 : vector<8xf32> to vector<8x1xf32>
    %cst_6 = arith.constant 3.125000e-02 : f32
    %12 = vector.broadcast %cst_6 : f32 to vector<8x1xf32>
    %13 = arith.mulf %11, %12 : vector<8x1xf32>
    %14 = vector.broadcast %13 : vector<8x1xf32> to vector<8x128xf32>
    %15 = arith.subf %9, %14 : vector<8x128xf32>
    %16 = arith.mulf %15, %15 : vector<8x128xf32>
    %cst_7 = arith.constant dense<0.000000e+00> : vector<8xf32>
    %17 = vector.multi_reduction <add>, %16, %cst_7 [1] : vector<8x128xf32> to vector<8xf32>
    %18 = vector.shape_cast %17 : vector<8xf32> to vector<8x1xf32>
    %cst_8 = arith.constant 9.600000e+01 : f32
    %19 = vector.broadcast %cst_8 : f32 to vector<8x1xf32>
    %20 = arith.mulf %19, %13 : vector<8x1xf32>
    %21 = arith.mulf %20, %13 : vector<8x1xf32>
    %22 = arith.subf %18, %21 : vector<8x1xf32>
    %cst_9 = arith.constant 3.125000e-02 : f32
    %23 = vector.broadcast %cst_9 : f32 to vector<8x1xf32>
    %24 = arith.mulf %22, %23 : vector<8x1xf32>
    %cst_10 = arith.constant 9.99999974E-6 : f32
    %25 = vector.broadcast %cst_10 : f32 to vector<8x1xf32>
    %26 = arith.addf %24, %25 : vector<8x1xf32>
    %27 = math.rsqrt %26 : vector<8x1xf32>
    %28 = vector.broadcast %27 : vector<8x1xf32> to vector<8x128xf32>
    %29 = arith.mulf %15, %28 : vector<8x128xf32>
    %30 = vector.broadcast %5 : vector<1x128xf32> to vector<8x128xf32>
    %31 = arith.mulf %29, %30 : vector<8x128xf32>
    %32 = vector.broadcast %6 : vector<1x128xf32> to vector<8x128xf32>
    %33 = arith.addf %31, %32 : vector<8x128xf32>
    %34 = vector.extract_strided_slice %33 {offsets = [0, 0], sizes = [8, 32], strides = [1, 1]} : vector<8x128xf32> to vector<8x32xf32>
    %c0_11 = arith.constant 0 : index
    %c0_12 = arith.constant 0 : index
    %35 = vector.load %arg4[%c0_11, %c0_12] : memref<8x32xf32, #tpu.memory_space<vmem>>, vector<8x32xf32>
    tpu.vector_store %arg4[%c0_11, %c0_12], %34 {strides = array<i32>} : memref<8x32xf32, #tpu.memory_space<vmem>>, vector<8x32xf32>,
    return
  }
  func.func @transform_0(%arg0: i32) -> (i32, i32) {
    %c0_i32 = arith.constant 0 : i32
    %c0_i32_0 = arith.constant 0 : i32
    return %arg0, %c0_i32 : i32, i32
  }
  func.func @transform_1(%arg0: i32) -> (i32, i32) {
    %c0_i32 = arith.constant 0 : i32
    %c0_i32_0 = arith.constant 0 : i32
    %c0_i32_1 = arith.constant 0 : i32
    return %c0_i32, %c0_i32_0 : i32, i32
  }
  func.func @transform_2(%arg0: i32) -> (i32, i32) {
    %c0_i32 = arith.constant 0 : i32
    %c0_i32_0 = arith.constant 0 : i32
    %c0_i32_1 = arith.constant 0 : i32
    return %c0_i32, %c0_i32_0 : i32, i32
  }
  func.func @transform_3(%arg0: i32) -> (i32, i32) {
    %c0_i32 = arith.constant 0 : i32
    %c0_i32_0 = arith.constant 0 : i32
    return %arg0, %c0_i32 : i32, i32
  }
}

</mosaic_0001>

<bundles_post_ra>
// kernel: tpu_custom_call.1
= control target key start
LH: loop header
LB: loop body
LE: loop exit
PB: predicated region body
PF: predicated region fallthrough
CT: control target
= control target key end

     0   :  { %8 = vsyncpa [#allocation3], 0  ;;  %s1024_s0 = inlined_call_operand.hbm [shape: f32[16,128], index: 0, kind: input, shape index: {}]   ;;  %s1025_s1 = inlined_call_operand.hbm [shape: f32[128,128], index: 1, kind: input, shape index: {}]   ;;  %s1026_s2 = inlined_call_operand.hbm [shape: f32[8,128], index: 2, kind: input, shape index: {}]   ;;  %s1027_s3 = inlined_call_operand.hbm [shape: f32[16,32], index: 3, kind: output, shape index: {}]  }
   0x1   :  { %10 = vsyncpa [#allocation3 + $0x1], 0 }
   0x2   :  { %11 = vsyncpa [#allocation6], 0 }
   0x3   :  { %12 = vsyncpa [#allocation4], 0 }
   0x4   :  { %14 = vsyncpa [#allocation4 + $0x1], 0  ;;  %s788_s12 = smov 0   ;;  %s790_s13 = smov 0  }
   0x5   :  { %s792_s14 = smov 0   ;;  %s794_s15 = smov 0  }
   0x6 LB: > { %s809_s16 = sadd.s32 4294967295, %s757_s15   ;;  %s435_s17 = sadd.s32 4294967294, %s757_s15   ;;  %s757_s15 = sphi %s794_s15, %s1047_s15   ;;  %s753_s14 = sphi %s792_s14, %s1046_s14   ;;  %s749_s13 = sphi %s790_s13, %s1045_s13   ;;  %s745_s12 = sphi %s788_s12, %s1044_s12  }
   0x7   : > { %p40_p0 = scmp.ne.s32.totalorder %s749_s13, %s745_s12  ;;  %p1028_p1 = scmp.eq.s32.totalorder %s809_s16, 0 }
   0x8   : > { %p112_p3 = scmp.eq.s32.totalorder %s435_s17, 1  ;;  %p436_p5 = scmp.ge.s32.totalorder %s757_s15, 1 }
   0x9   : > { %p818_p4 = por %p1028_p1, %p40_p0  ;;  %p119_p7 = scmp.lt.s32.totalorder %s757_s15, 3 }
   0xa   : > { %p823_p6 = por %p112_p3, %p40_p0  ;;  %s759_s21 = smov [#allocation5]  }
   0xb   : > { %s1031_s18 = scalar_select %p818_p4, 1, 0 }
   0xc   : > { %s1032_s19 = scalar_select %p823_p6, 1, 0 }
   0xd   : > { %p828_p8 = pnand %p436_p5, %p119_p7  ;;  %s131_s22 = sshll.u32 %s759_s21, 4  ;;  %s832_s22 = int_to_ptr.vmem [resolvable:$true] %s131_s22 }
   0xe   : > { %s760_s24 = smov [#allocation7]   ;;  %s601_s28 = scalar_lea.hbm %s1025_s1, 2048 }
   0xf   : > { %p539_p9 = pneg %p828_p8  ;;  %s145_s25 = sshll.u32 %s760_s24, 4  ;;  %s843_s25 = int_to_ptr.vmem [resolvable:$true] %s145_s25 }
  0x10   : > { %p602_p12 = scmp.ne.s32.totalorder %s1025_s1, %s601_s28  ;;  %p608_p5 = scmp.lt.u32.totalorder %s601_s28, %s1025_s1 }
  0x11   : > { %p839_p11 = pnand %p539_p9, %p1028_p1 }
  0x13   : > { %p603_p13 = pneg %p839_p11 }
  0x15   : > { %p604_p0 = pnand %p603_p13, %p602_p12 }
  0x17   : > { %p605_p3 = pneg %p604_p0 }
  0x19   : > { %p610_p7 = pnand %p608_p5, %p605_p3 }
  0x1b   : > { %613 = shalt.err (!%p610_p7)
}
  0x1c   : > { %s614_s6 = scalar_lea.vmem %s832_s22, 2048  ;;  %p622_p2 = scmp.lt.s32.totalorder %s832_s22, %s832_s22 }
  0x1d   : > { %p615_p9 = scmp.ne.s32.totalorder %s832_s22, %s614_s6  ;;  %p623_p12 = scmp.lt.s32.totalorder %s614_s6, %s614_s6 }
  0x1f   : > { %p617_p10 = pnand %p615_p9, %p603_p13  ;;  %p624_p0 = por %p623_p12, %p622_p2 }
  0x21   : > { %p618_p1 = pneg %p617_p10 }
  0x23   : > { %p625_p6 = pnand %p624_p0, %p618_p1 }
  0x25   : > { %628 = shalt.err (!%p625_p6)
}
  0x26   : > { %s761_s7 = smov 128   ;;  %s762_s8 = smov 8  }
  0x27   : > { %542 = dma.hbm_to_vmem [thread:$0]  (!%p839_p11), %s1025_s1, 2048, %s832_s22, [#allocation6], %s761_s7, %s761_s7, %s762_s8  }
  0x28   : > { %s629_s21 = scalar_lea.hbm %s1026_s2, 128 }
  0x29   : > { %p630_p2 = scmp.ne.s32.totalorder %s1026_s2, %s629_s21  ;;  %p636_p10 = scmp.lt.u32.totalorder %s629_s21, %s1026_s2 }
  0x2b   : > { %p632_p1 = pnand %p630_p2, %p603_p13 }
  0x2d   : > { %p633_p6 = pneg %p632_p1 }
  0x2f   : > { %p638_p3 = pnand %p636_p10, %p633_p6 }
  0x31   : > { %641 = shalt.err (!%p638_p3)
}
  0x32   : > { %s642_s22 = scalar_lea.vmem %s843_s25, 128  ;;  %p650_p12 = scmp.lt.s32.totalorder %s843_s25, %s843_s25 }
  0x33   : > { %p643_p5 = scmp.ne.s32.totalorder %s843_s25, %s642_s22  ;;  %p651_p0 = scmp.lt.s32.totalorder %s642_s22, %s642_s22 }
  0x35   : > { %p645_p7 = pnand %p643_p5, %p603_p13  ;;  %p652_p2 = por %p651_p0, %p650_p12 }
  0x37   : > { %p646_p9 = pneg %p645_p7 }
  0x39   : > { %p653_p1 = pnand %p652_p2, %p646_p9 }
  0x3b   : > { %656 = shalt.err (!%p653_p1)
}
  0x3c   : > { %545 = dma.hbm_to_vmem [thread:$0]  (!%p839_p11), %s1026_s2, 128, %s843_s25, [#allocation6]  }
  0x3d   : > { %s898_s4 = sadd.s32 1, %s757_s15   ;;  %s27_s23 = sadd.s32 1, %s753_s14 }
  0x3e   : > { %s24_s5 = ssub.s32 %s757_s15, %s898_s4  ;;  %p34_p13 = scmp.ne.s32.totalorder %s753_s14, %s749_s13 }
  0x3f   : > { %p25_p6 = scmp.eq.s32.totalorder %s24_s5, 0  ;;  %p35_p10 = scmp.eq.s32.totalorder %s757_s15, 0 }
  0x40   : > { %p1035_p3 = scmp.eq.s32.totalorder %s809_s16, 1  ;;  %p556_p7 = scmp.lt.s32.totalorder %s757_s15, 2 }
  0x41   : > { %s914_s7 = scalar_select %p25_p6, %s753_s14, %s27_s23  }
  0x42   : > { %p908_p5 = por %p1035_p3, %p34_p13  ;;  %p36_p9 = por %p35_p10, %p34_p13 }
  0x43   : > { %s156_s8 = sand.u32 1, %s753_s14   ;;  %s441_s25 = sshll.u32 %s757_s15, 7 }
  0x44   : > { %s1036_s6 = scalar_select %p908_p5, 1, 0 }
  0x45   : > { %s440_s9 = sshll.u32 %s156_s8, 3  ;;  %s921_s17 = scalar_lea.hbm %s1024_s0, %s441_s25 }
  0x46   : > { %s160_s21 = scalar_lea.vmem [#allocation2], %s440_s9  ;;  %p925_p11 = pnand %p556_p7, %p36_p9 }
  0x47   : > { %s167_s24 = sshll.u32 %s160_s21, 4  ;;  %s157_s27 = scalar_lea.sflag [#allocation3], %s156_s8  ;;  %s923_s24 = int_to_ptr.vmem [resolvable:$true] %s167_s24 }
  0x48   : > { %s657_s28 = scalar_lea.hbm %s921_s17, 128  ;;  %p659_p0 = pneg %p925_p11 }
  0x49   : > { %p658_p12 = scmp.ne.s32.totalorder %s921_s17, %s657_s28  ;;  %s662_s30 = scalar_lea.hbm %s1024_s0, 256 }
  0x4a   : > { %p663_p13 = scmp.lt.u32.totalorder %s921_s17, %s1024_s0  ;;  %p664_p6 = scmp.lt.u32.totalorder %s662_s30, %s657_s28 }
  0x4b   : > { %p660_p2 = pnand %p659_p0, %p658_p12  ;;  %p666_p3 = scmp.lt.u32.totalorder %s657_s28, %s921_s17 }
  0x4c   : > { %p665_p10 = por %p664_p6, %p663_p13 }
  0x4d   : > { %p661_p1 = pneg %p660_p2 }
  0x4e   : > { %p667_p7 = por %p666_p3, %p665_p10 }
  0x50   : > { %p668_p9 = pnand %p667_p7, %p661_p1 }
  0x52   : > { %671 = shalt.err (!%p668_p9)
}
  0x53   : > { %s672_s8 = scalar_lea.vmem %s923_s24, 128  ;;  %s763_s9 = smov [#allocation2]  }
  0x54   : > { %p673_p12 = scmp.ne.s32.totalorder %s923_s24, %s672_s8  ;;  %s677_s25 = sshll.u32 %s763_s9, 4  ;;  %s678_s25 = int_to_ptr.vmem [resolvable:$false] %s677_s25 }
  0x55   : > { %s679_s10 = scalar_lea.vmem %s678_s25, 256  ;;  %p680_p4 = scmp.lt.s32.totalorder %s923_s24, %s678_s25 }
  0x56   : > { %p675_p2 = pnand %p673_p12, %p659_p0  ;;  %p681_p13 = scmp.lt.s32.totalorder %s679_s10, %s672_s8 }
  0x58   : > { %p676_p5 = pneg %p675_p2  ;;  %p682_p6 = por %p681_p13, %p680_p4 }
  0x5a   : > { %p683_p10 = pnand %p682_p6, %p676_p5 }
  0x5c   : > { %686 = shalt.err (!%p683_p10)
}
  0x5d   : > { %549 = dma.hbm_to_vmem [thread:$0]  (!%p925_p11), %s921_s17, 128, %s923_s24, %s157_s27  }
  0x5e   : > { %176 = sbr.rel (%p828_p8) target bundleno = 682 (0x2aa), region = 32  ;;  %s957_s11 = sand.u32 (!%p828_p8), 1, %s749_s13  }
  0x5f   : > { %s443_s21 = sshll.u32 (!%p828_p8), %s957_s11, 3  ;;  %s179_s28 = scalar_lea.sflag (!%p828_p8), [#allocation3], %s957_s11 }
  0x60   : > { %s963_s22 = scalar_lea.vmem (!%p828_p8), [#allocation2], %s443_s21  ;;  %p1038_p4 = scmp.ne.s32.totalorder (!%p828_p8), %s1031_s18, 0 }
  0x65   : > { %732 = dma.done.wait (%p1038_p4), %s179_s28, 128  }
  0x66   : > { %734 = vsyncadd (%p1038_p4), %s179_s28, 4294967168  ;;  %p1039_p5 = scmp.eq.s32.totalorder %s809_s16, 0 }
  0x68   : > { %736 = dma.done.wait (%p1039_p5), [#allocation6], 2176   ;;  %p1040_p8 = pmov %p1039_p5 }
  0x69   : > { %v764_v0 = vmov 0.0|0.0   ;;  %vm765_vm0 = vmmov 0   ;;  %v766_v1 = vmov 0.0   ;;  %v214_v2 = vld [vmem:[#allocation5] sm:$0xff]  ;;  %v215_v3 = vld [vmem:[#allocation5 + $0x8] sm:$0xff]  ;;  %v216_v4 = vld [vmem:[#allocation5 + $0x10] sm:$0xff]  ;;  %v231_v27 = vlaneseq }
  0x6a   : > { %738 = vsyncadd (%p1040_p8), [#allocation6], 4294965120  ;;  %503 = vmatprep.subr.bf16.mxu0 %v764_v0  ;;  %500 = vmatprep.mubr.msk.f32.mxu0 %vm765_vm0, %v766_v1  ;;  %v504_v5 = vpack.c.bf16 %v215_v3, %v214_v2  ;;  %v217_v6 = vld [vmem:[#allocation5 + $0x18] sm:$0xff]  ;;  %v218_v8 = vld [vmem:[#allocation5 + $0x20] sm:$0xff]  ;;  %s448_s18 = sshll.u32 %s809_s16, 7  ;;  %s212_s20 = scalar_lea.vmem [#allocation8], %s443_s21 }
  0x6b   : > { %v507_v7 = vpack.c.bf16 %v217_v6, %v216_v4  ;;  %v219_v9 = vld [vmem:[#allocation5 + $0x28] sm:$0xff]  ;;  %v220_v11 = vld [vmem:[#allocation5 + $0x30] sm:$0xff]  ;;  %v221_v12 = vld [vmem:[#allocation5 + $0x38] sm:$0xff]  ;;  %v232_v28 = vshrl.u32 %v231_v27, 7  ;;  %s346_s17 = sshll.u32 %s212_s20, 4  ;;  %vm330_vm1 = vcmask 261120   ;;  %s980_s27 = scalar_lea.hbm %s1027_s3, %s448_s18  ;;  %s982_s17 = int_to_ptr.vmem [resolvable:$true] %s346_s17 }
  0x6c   : > { %505 = vmatpush3.bf16.msra.mxu0 %v504_v5  ;;  %v510_v10 = vpack.c.bf16 %v219_v9, %v218_v8  ;;  %v513_v13 = vpack.c.bf16 %v221_v12, %v220_v11  ;;  %v222_v14 = vld [vmem:[#allocation5 + $0x40] sm:$0xff]  ;;  %v223_v15 = vld [vmem:[#allocation5 + $0x48] sm:$0xff]  ;;  %v224_v17 = vld [vmem:[#allocation5 + $0x50] sm:$0xff]  ;;  %s333_s29 = scalar_lea.sflag [#allocation4], %s957_s11  ;;  %s687_s30 = scalar_lea.vmem %s982_s17, 128 }
  0x6d   : > { %506 = vmatprep.subr.bf16.mxu0 %v764_v0  ;;  %v516_v16 = vpack.c.bf16 %v223_v15, %v222_v14  ;;  %v225_v18 = vld [vmem:[#allocation5 + $0x58] sm:$0xff]  ;;  %v226_v20 = vld [vmem:[#allocation5 + $0x60] sm:$0xff]  ;;  %v227_v21 = vld [vmem:[#allocation5 + $0x68] sm:$0xff]  ;;  %v233_v29 = vsub.s32 0, %v232_v28  ;;  %v322_v46 = vsub.s32 1, %v232_v28  ;;  %v327_v47 = vsub.s32 2, %v232_v28  ;;  %p688_p11 = scmp.ne.s32.totalorder %s982_s17, %s687_s30 }
  0x6e   : > { %v519_v19 = vpack.c.bf16 %v225_v18, %v224_v17  ;;  %v522_v22 = vpack.c.bf16 %v227_v21, %v226_v20  ;;  %v228_v23 = vld [vmem:[#allocation5 + $0x70] sm:$0xff]  ;;  %v229_v24 = vld [vmem:[#allocation5 + $0x78] sm:$0xff]  ;;  %v230_v30 = vld [vmem:[#allocation7] sm:$0xff]  ;;  %p1041_p0 = scmp.ne.s32.totalorder %s1036_s6, 0  ;;  %s767_s16 = smov [#allocation8]  }
  0x6f   : > { %v525_v25 = vpack.c.bf16 %v229_v24, %v228_v23  ;;  %v213_v26 = vld [vmem:[%s963_s22] sm:$0xff]  ;;  %v234_v31 = vrot.slane %v230_v30, %v233_v29  ;;  %v323_v48 = vrot.slane %v230_v30, %v322_v46  ;;  %v328_v50 = vrot.slane %v230_v30, %v327_v47  ;;  %s691_s23 = sshll.u32 %s767_s16, 4  ;;  %s692_s23 = int_to_ptr.vmem [resolvable:$false] %s691_s23 }
  0x70   : > { %508 = vmatpush3.bf16.msra.mxu0 %v507_v7  ;;  %p689_p1 = pnand %p688_p11, %p1041_p0  ;;  %s693_s5 = scalar_lea.vmem %s692_s23, 256 }
  0x71   : > { %509 = vmatprep.subr.bf16.mxu0 %v764_v0  ;;  %p694_p7 = scmp.lt.s32.totalorder %s982_s17, %s692_s23  ;;  %p695_p9 = scmp.lt.s32.totalorder %s693_s5, %s687_s30 }
  0x72   : > { %p690_p3 = pneg %p689_p1 }
  0x73   : > { %p696_p12 = por %p695_p9, %p694_p7 }
  0x74   : > { %511 = vmatpush3.bf16.msra.mxu0 %v510_v10 }
  0x75   : > { %512 = vmatprep.subr.bf16.mxu0 %v764_v0  ;;  %p697_p2 = pnand %p696_p12, %p690_p3 }
  0x78   : > { %514 = vmatpush3.bf16.msra.mxu0 %v513_v13 }
  0x79   : > { %515 = vmatprep.subr.bf16.mxu0 %v764_v0 }
  0x7c   : > { %517 = vmatpush3.bf16.msra.mxu0 %v516_v16 }
  0x7d   : > { %518 = vmatprep.subr.bf16.mxu0 %v764_v0 }
  0x80   : > { %520 = vmatpush3.bf16.msra.mxu0 %v519_v19 }
  0x81   : > { %521 = vmatprep.subr.bf16.mxu0 %v764_v0 }
  0x84   : > { %523 = vmatpush3.bf16.msra.mxu0 %v522_v22 }
  0x85   : > { %524 = vmatprep.subr.bf16.mxu0 %v764_v0 }
  0x88   : > { %526 = vmatpush3.bf16.msra.mxu0 %v525_v25 }
  0x8b   : > { %501 = vmatmul.mubr.f32.vlgmr.msra.gmra.mrb[0].mxu0 %v213_v26 }
 0x15e   : > { %v301_v32 = vpop.f32.mrb[0].mxu0 }
 0x15f   : > { %v302_v33 = vadd.f32 %v301_v32, %v234_v31  ;;  %v502_v34 = vpop.f32.mrb[1].mxu0 }
 0x161   : > { %v305_v35 = vadd.f32 %v302_v33, %v213_v26 }
 0x163   : > { %306 = vadd.xlane.f32.xlu0 %v305_v35 }
 0x1f0   : > { %v307_v36 = vpop.xlane.xlu0 %306 }
 0x1f1   : > { %v308_v37 = vmul.f32 0.03125, %v307_v36 }
 0x1f3   : > { %v309_v38 = vsub.f32 %v305_v35, %v308_v37  ;;  %v313_v40 = vmul.f32 96.0, %v308_v37 }
 0x1f5   : > { %v310_v39 = vmul.f32 %v309_v38, %v309_v38  ;;  %v314_v41 = vmul.f32 %v313_v40, %v308_v37 }
 0x1f7   : > { %311 = vadd.xlane.f32.xlu0 %v310_v39 }
 0x284   : > { %v312_v42 = vpop.xlane.xlu0 %311 }
 0x285   : > { %v315_v43 = vsub.f32 %v312_v42, %v314_v41 }
 0x287   : > { %v316_v44 = vmul.f32 0.03125, %v315_v43 }
 0x289   : > { %v317_v45 = vadd.f32 1e-05, %v316_v44 }
 0x28b   : > { %599 = vrsqrt.f32 %v317_v45 }
 0x295   : > { %v600_v49 = vpop.eup %599 }
 0x296   : > { %v319_v51 = vmul.f32 %v600_v49, %v309_v38 }
 0x298   : > { %v324_v52 = vmul.f32 %v323_v48, %v319_v51 }
 0x29a   : > { %v329_v53 = vadd.f32 %v328_v50, %v324_v52 }
 0x29c   : > { %331 = vst.msk [vmem:[%s212_s20] sm:$0xff] %vm330_vm1, %v329_v53 }
 0x29d   : > { %700 = shalt.err (!%p697_p2)
}
 0x29e   : > { %s701_s8 = scalar_lea.hbm %s980_s27, 128  ;;  %s705_s10 = scalar_lea.hbm %s1027_s3, 256 }
 0x29f   : > { %p702_p13 = scmp.ne.s32.totalorder %s980_s27, %s701_s8  ;;  %p706_p4 = scmp.lt.u32.totalorder %s980_s27, %s1027_s3 }
 0x2a0   : > { %p707_p5 = scmp.lt.u32.totalorder %s705_s10, %s701_s8  ;;  %p709_p11 = scmp.lt.u32.totalorder %s701_s8, %s980_s27 }
 0x2a1   : > { %p703_p6 = pnand %p702_p13, %p1041_p0 }
 0x2a2   : > { %p708_p8 = por %p707_p5, %p706_p4 }
 0x2a3   : > { %p704_p10 = pneg %p703_p6 }
 0x2a4   : > { %p710_p1 = por %p709_p11, %p708_p8 }
 0x2a6   : > { %p711_p3 = pnand %p710_p1, %p704_p10 }
 0x2a8   : > { %714 = shalt.err (!%p711_p3)
}
 0x2a9   : > { %537 = dma.vmem_to_hbm [thread:$0]  (%p1041_p0), %s982_s17, 128, %s980_s27, %s333_s29  }
 0x2aa PF: > { %s358_s28 = sand.u32 1, %s745_s12   ;;  %p1042_p7 = scmp.ne.s32.totalorder %s1032_s19, 0 }
 0x2ab   : > { %p1043_p9 = scmp.ge.s32.totalorder %s757_s15, 2  ;;  %s359_s22 = scalar_lea.sflag [#allocation4], %s358_s28 }
 0x2ad   : > { %p551_p12 = pnand %p1043_p9, %p1042_p7 }
 0x2af   : > { %740 = dma.done.wait (!%p551_p12), %s359_s22, 128  }
 0x2b0   : > { %742 = vsyncadd (!%p551_p12), %s359_s22, 4294967168  ;;  %p17_p2 = scmp.ge.s32.totalorder %s898_s4, 4   ;;  %s1044_s12 = smov %s749_s13 }
 0x2b1   : > { %s1045_s13 = smov %s753_s14  ;;  %s1046_s14 = smov %s914_s7 }
 0x2b2   : > { %s1047_s15 = smov %s898_s4  ;;  %19 = sbr.rel (!%p17_p2) target bundleno = 6 (0x6), region = 85 }
 0x2b9   :  { %364 = vsyncpa [#allocation3], 1 }
 0x2ba   :  { %366 = vsyncpa [#allocation3 + $0x1], 1 }
 0x2bb   :  { %367 = vsyncpa [#allocation6], 1 }
 0x2bc   :  { %368 = vsyncpa [#allocation4], 1 }
 0x2bd   :  { %370 = vsyncpa [#allocation4 + $0x1], 1 }

// kernel: tpu_custom_call.1
= control target key start
LH: loop header
LB: loop body
LE: loop exit
PB: predicated region body
PF: predicated region fallthrough
CT: control target
= control target key end

     0   :  { %8 = vsyncpa [#allocation3], 0  ;;  %s1024_s0 = inlined_call_operand.hbm [shape: f32[16,128], index: 0, kind: input, shape index: {}]   ;;  %s1025_s1 = inlined_call_operand.hbm [shape: f32[128,128], index: 1, kind: input, shape index: {}]   ;;  %s1026_s2 = inlined_call_operand.hbm [shape: f32[8,128], index: 2, kind: input, shape index: {}]   ;;  %s1027_s3 = inlined_call_operand.hbm [shape: f32[16,32], index: 3, kind: output, shape index: {}]  }
   0x1   :  { %10 = vsyncpa [#allocation3 + $0x1], 0 }
   0x2   :  { %11 = vsyncpa [#allocation6], 0 }
   0x3   :  { %12 = vsyncpa [#allocation4], 0 }
   0x4   :  { %14 = vsyncpa [#allocation4 + $0x1], 0  ;;  %s788_s12 = smov 0   ;;  %s790_s13 = smov 0  }
   0x5   :  { %s792_s14 = smov 0   ;;  %s794_s15 = smov 0  }
   0x6 LB: > { %s809_s16 = sadd.s32 4294967295, %s757_s15   ;;  %s435_s17 = sadd.s32 4294967294, %s757_s15   ;;  %s757_s15 = sphi %s794_s15, %s1047_s15   ;;  %s753_s14 = sphi %s792_s14, %s1046_s14   ;;  %s749_s13 = sphi %s790_s13, %s1045_s13   ;;  %s745_s12 = sphi %s788_s12, %s1044_s12  }
   0x7   : > { %p40_p0 = scmp.ne.s32.totalorder %s749_s13, %s745_s12  ;;  %p1028_p1 = scmp.eq.s32.totalorder %s809_s16, 0 }
   0x8   : > { %p112_p3 = scmp.eq.s32.totalorder %s435_s17, 1  ;;  %p436_p5 = scmp.ge.s32.totalorder %s757_s15, 1 }
   0x9   : > { %p818_p4 = por %p1028_p1, %p40_p0  ;;  %p119_p7 = scmp.lt.s32.totalorder %s757_s15, 3 }
   0xa   : > { %p823_p6 = por %p112_p3, %p40_p0  ;;  %s759_s21 = smov [#allocation5]  }
   0xb   : > { %s1031_s18 = scalar_select %p818_p4, 1, 0 }
   0xc   : > { %s1032_s19 = scalar_select %p823_p6, 1, 0 }
   0xd   : > { %p828_p8 = pnand %p436_p5, %p119_p7  ;;  %s131_s22 = sshll.u32 %s759_s21, 4  ;;  %s832_s22 = int_to_ptr.vmem [resolvable:$true] %s131_s22 }
   0xe   : > { %s760_s24 = smov [#allocation7]   ;;  %s601_s28 = scalar_lea.hbm %s1025_s1, 2048 }
   0xf   : > { %p539_p9 = pneg %p828_p8  ;;  %s145_s25 = sshll.u32 %s760_s24, 4  ;;  %s843_s25 = int_to_ptr.vmem [resolvable:$true] %s145_s25 }
  0x10   : > { %p602_p12 = scmp.ne.s32.totalorder %s1025_s1, %s601_s28  ;;  %p608_p5 = scmp.lt.u32.totalorder %s601_s28, %s1025_s1 }
  0x11   : > { %p839_p11 = pnand %p539_p9, %p1028_p1 }
  0x13   : > { %p603_p13 = pneg %p839_p11 }
  0x15   : > { %p604_p0 = pnand %p603_p13, %p602_p12 }
  0x17   : > { %p605_p3 = pneg %p604_p0 }
  0x19   : > { %p610_p7 = pnand %p608_p5, %p605_p3 }
  0x1b   : > { %613 = shalt.err (!%p610_p7)
}
  0x1c   : > { %s614_s6 = scalar_lea.vmem %s832_s22, 2048  ;;  %p622_p2 = scmp.lt.s32.totalorder %s832_s22, %s832_s22 }
  0x1d   : > { %p615_p9 = scmp.ne.s32.totalorder %s832_s22, %s614_s6  ;;  %p623_p12 = scmp.lt.s32.totalorder %s614_s6, %s614_s6 }
  0x1f   : > { %p617_p10 = pnand %p615_p9, %p603_p13  ;;  %p624_p0 = por %p623_p12, %p622_p2 }
  0x21   : > { %p618_p1 = pneg %p617_p10 }
  0x23   : > { %p625_p6 = pnand %p624_p0, %p618_p1 }
  0x25   : > { %628 = shalt.err (!%p625_p6)
}
  0x26   : > { %s761_s7 = smov 128   ;;  %s762_s8 = smov 8  }
  0x27   : > { %542 = dma.hbm_to_vmem [thread:$0]  (!%p839_p11), %s1025_s1, 2048, %s832_s22, [#allocation6], %s761_s7, %s761_s7, %s762_s8  }
  0x28   : > { %s629_s21 = scalar_lea.hbm %s1026_s2, 128 }
  0x29   : > { %p630_p2 = scmp.ne.s32.totalorder %s1026_s2, %s629_s21  ;;  %p636_p10 = scmp.lt.u32.totalorder %s629_s21, %s1026_s2 }
  0x2b   : > { %p632_p1 = pnand %p630_p2, %p603_p13 }
  0x2d   : > { %p633_p6 = pneg %p632_p1 }
  0x2f   : > { %p638_p3 = pnand %p636_p10, %p633_p6 }
  0x31   : > { %641 = shalt.err (!%p638_p3)
}
  0x32   : > { %s642_s22 = scalar_lea.vmem %s843_s25, 128  ;;  %p650_p12 = scmp.lt.s32.totalorder %s843_s25, %s843_s25 }
  0x33   : > { %p643_p5 = scmp.ne.s32.totalorder %s843_s25, %s642_s22  ;;  %p651_p0 = scmp.lt.s32.totalorder %s642_s22, %s642_s22 }
  0x35   : > { %p645_p7 = pnand %p643_p5, %p603_p13  ;;  %p652_p2 = por %p651_p0, %p650_p12 }
  0x37   : > { %p646_p9 = pneg %p645_p7 }
  0x39   : > { %p653_p1 = pnand %p652_p2, %p646_p9 }
  0x3b   : > { %656 = shalt.err (!%p653_p1)
}
  0x3c   : > { %545 = dma.hbm_to_vmem [thread:$0]  (!%p839_p11), %s1026_s2, 128, %s843_s25, [#allocation6]  }
  0x3d   : > { %s898_s4 = sadd.s32 1, %s757_s15   ;;  %s27_s23 = sadd.s32 1, %s753_s14 }
  0x3e   : > { %s24_s5 = ssub.s32 %s757_s15, %s898_s4  ;;  %p34_p13 = scmp.ne.s32.totalorder %s753_s14, %s749_s13 }
  0x3f   : > { %p25_p6 = scmp.eq.s32.totalorder %s24_s5, 0  ;;  %p35_p10 = scmp.eq.s32.totalorder %s757_s15, 0 }
  0x40   : > { %p1035_p3 = scmp.eq.s32.totalorder %s809_s16, 1  ;;  %p556_p7 = scmp.lt.s32.totalorder %s757_s15, 2 }
  0x41   : > { %s914_s7 = scalar_select %p25_p6, %s753_s14, %s27_s23  }
  0x42   : > { %p908_p5 = por %p1035_p3, %p34_p13  ;;  %p36_p9 = por %p35_p10, %p34_p13 }
  0x43   : > { %s156_s8 = sand.u32 1, %s753_s14   ;;  %s441_s25 = sshll.u32 %s757_s15, 7 }
  0x44   : > { %s1036_s6 = scalar_select %p908_p5, 1, 0 }
  0x45   : > { %s440_s9 = sshll.u32 %s156_s8, 3  ;;  %s921_s17 = scalar_lea.hbm %s1024_s0, %s441_s25 }
  0x46   : > { %s160_s21 = scalar_lea.vmem [#allocation2], %s440_s9  ;;  %p925_p11 = pnand %p556_p7, %p36_p9 }
  0x47   : > { %s167_s24 = sshll.u32 %s160_s21, 4  ;;  %s157_s27 = scalar_lea.sflag [#allocation3], %s156_s8  ;;  %s923_s24 = int_to_ptr.vmem [resolvable:$true] %s167_s24 }
  0x48   : > { %s657_s28 = scalar_lea.hbm %s921_s17, 128  ;;  %p659_p0 = pneg %p925_p11 }
  0x49   : > { %p658_p12 = scmp.ne.s32.totalorder %s921_s17, %s657_s28  ;;  %s662_s30 = scalar_lea.hbm %s1024_s0, 256 }
  0x4a   : > { %p663_p13 = scmp.lt.u32.totalorder %s921_s17, %s1024_s0  ;;  %p664_p6 = scmp.lt.u32.totalorder %s662_s30, %s657_s28 }
  0x4b   : > { %p660_p2 = pnand %p659_p0, %p658_p12  ;;  %p666_p3 = scmp.lt.u32.totalorder %s657_s28, %s921_s17 }
  0x4c   : > { %p665_p10 = por %p664_p6, %p663_p13 }
  0x4d   : > { %p661_p1 = pneg %p660_p2 }
  0x4e   : > { %p667_p7 = por %p666_p3, %p665_p10 }
  0x50   : > { %p668_p9 = pnand %p667_p7, %p661_p1 }
  0x52   : > { %671 = shalt.err (!%p668_p9)
}
  0x53   : > { %s672_s8 = scalar_lea.vmem %s923_s24, 128  ;;  %s763_s9 = smov [#allocation2]  }
  0x54   : > { %p673_p12 = scmp.ne.s32.totalorder %s923_s24, %s672_s8  ;;  %s677_s25 = sshll.u32 %s763_s9, 4  ;;  %s678_s25 = int_to_ptr.vmem [resolvable:$false] %s677_s25 }
  0x55   : > { %s679_s10 = scalar_lea.vmem %s678_s25, 256  ;;  %p680_p4 = scmp.lt.s32.totalorder %s923_s24, %s678_s25 }
  0x56   : > { %p675_p2 = pnand %p673_p12, %p659_p0  ;;  %p681_p13 = scmp.lt.s32.totalorder %s679_s10, %s672_s8 }
  0x58   : > { %p676_p5 = pneg %p675_p2  ;;  %p682_p6 = por %p681_p13, %p680_p4 }
  0x5a   : > { %p683_p10 = pnand %p682_p6, %p676_p5 }
  0x5c   : > { %686 = shalt.err (!%p683_p10)
}
  0x5d   : > { %549 = dma.hbm_to_vmem [thread:$0]  (!%p925_p11), %s921_s17, 128, %s923_s24, %s157_s27  }
  0x5e   : > { %176 = sbr.rel (%p828_p8) target bundleno = 682 (0x2aa), region = 32  ;;  %s957_s11 = sand.u32 (!%p828_p8), 1, %s749_s13  }
  0x5f   : > { %s443_s21 = sshll.u32 (!%p828_p8), %s957_s11, 3  ;;  %s179_s28 = scalar_lea.sflag (!%p828_p8), [#allocation3], %s957_s11 }
  0x60   : > { %s963_s22 = scalar_lea.vmem (!%p828_p8), [#allocation2], %s443_s21  ;;  %p1038_p4 = scmp.ne.s32.totalorder (!%p828_p8), %s1031_s18, 0 }
  0x65   : > { %732 = dma.done.wait (%p1038_p4), %s179_s28, 128  }
  0x66   : > { %734 = vsyncadd (%p1038_p4), %s179_s28, 4294967168  ;;  %p1039_p5 = scmp.eq.s32.totalorder %s809_s16, 0 }
  0x68   : > { %736 = dma.done.wait (%p1039_p5), [#allocation6], 2176   ;;  %p1040_p8 = pmov %p1039_p5 }
  0x69   : > { %v764_v0 = vmov 0.0|0.0   ;;  %vm765_vm0 = vmmov 0   ;;  %v766_v1 = vmov 0.0   ;;  %v214_v2 = vld [vmem:[#allocation5] sm:$0xff]  ;;  %v215_v3 = vld [vmem:[#allocation5 + $0x8] sm:$0xff]  ;;  %v216_v4 = vld [vmem:[#allocation5 + $0x10] sm:$0xff]  ;;  %v231_v27 = vlaneseq }
  0x6a   : > { %738 = vsyncadd (%p1040_p8), [#allocation6], 4294965120  ;;  %503 = vmatprep.subr.bf16.mxu0 %v764_v0  ;;  %500 = vmatprep.mubr.msk.f32.mxu0 %vm765_vm0, %v766_v1  ;;  %v504_v5 = vpack.c.bf16 %v215_v3, %v214_v2  ;;  %v217_v6 = vld [vmem:[#allocation5 + $0x18] sm:$0xff]  ;;  %v218_v8 = vld [vmem:[#allocation5 + $0x20] sm:$0xff]  ;;  %s448_s18 = sshll.u32 %s809_s16, 7  ;;  %s212_s20 = scalar_lea.vmem [#allocation8], %s443_s21 }
  0x6b   : > { %v507_v7 = vpack.c.bf16 %v217_v6, %v216_v4  ;;  %v219_v9 = vld [vmem:[#allocation5 + $0x28] sm:$0xff]  ;;  %v220_v11 = vld [vmem:[#allocation5 + $0x30] sm:$0xff]  ;;  %v221_v12 = vld [vmem:[#allocation5 + $0x38] sm:$0xff]  ;;  %v232_v28 = vshrl.u32 %v231_v27, 7  ;;  %s346_s17 = sshll.u32 %s212_s20, 4  ;;  %vm330_vm1 = vcmask 261120   ;;  %s980_s27 = scalar_lea.hbm %s1027_s3, %s448_s18  ;;  %s982_s17 = int_to_ptr.vmem [resolvable:$true] %s346_s17 }
  0x6c   : > { %505 = vmatpush3.bf16.msra.mxu0 %v504_v5  ;;  %v510_v10 = vpack.c.bf16 %v219_v9, %v218_v8  ;;  %v513_v13 = vpack.c.bf16 %v221_v12, %v220_v11  ;;  %v222_v14 = vld [vmem:[#allocation5 + $0x40] sm:$0xff]  ;;  %v223_v15 = vld [vmem:[#allocation5 + $0x48] sm:$0xff]  ;;  %v224_v17 = vld [vmem:[#allocation5 + $0x50] sm:$0xff]  ;;  %s333_s29 = scalar_lea.sflag [#allocation4], %s957_s11  ;;  %s687_s30 = scalar_lea.vmem %s982_s17, 128 }
  0x6d   : > { %506 = vmatprep.subr.bf16.mxu0 %v764_v0  ;;  %v516_v16 = vpack.c.bf16 %v223_v15, %v222_v14  ;;  %v225_v18 = vld [vmem:[#allocation5 + $0x58] sm:$0xff]  ;;  %v226_v20 = vld [vmem:[#allocation5 + $0x60] sm:$0xff]  ;;  %v227_v21 = vld [vmem:[#allocation5 + $0x68] sm:$0xff]  ;;  %v233_v29 = vsub.s32 0, %v232_v28  ;;  %v322_v46 = vsub.s32 1, %v232_v28  ;;  %v327_v47 = vsub.s32 2, %v232_v28  ;;  %p688_p11 = scmp.ne.s32.totalorder %s982_s17, %s687_s30 }
  0x6e   : > { %v519_v19 = vpack.c.bf16 %v225_v18, %v224_v17  ;;  %v522_v22 = vpack.c.bf16 %v227_v21, %v226_v20  ;;  %v228_v23 = vld [vmem:[#allocation5 + $0x70] sm:$0xff]  ;;  %v229_v24 = vld [vmem:[#allocation5 + $0x78] sm:$0xff]  ;;  %v230_v30 = vld [vmem:[#allocation7] sm:$0xff]  ;;  %p1041_p0 = scmp.ne.s32.totalorder %s1036_s6, 0  ;;  %s767_s16 = smov [#allocation8]  }
  0x6f   : > { %v525_v25 = vpack.c.bf16 %v229_v24, %v228_v23  ;;  %v213_v26 = vld [vmem:[%s963_s22] sm:$0xff]  ;;  %v234_v31 = vrot.slane %v230_v30, %v233_v29  ;;  %v323_v48 = vrot.slane %v230_v30, %v322_v46  ;;  %v328_v50 = vrot.slane %v230_v30, %v327_v47  ;;  %s691_s23 = sshll.u32 %s767_s16, 4  ;;  %s692_s23 = int_to_ptr.vmem [resolvable:$false] %s691_s23 }
  0x70   : > { %508 = vmatpush3.bf16.msra.mxu0 %v507_v7  ;;  %p689_p1 = pnand %p688_p11, %p1041_p0  ;;  %s693_s5 = scalar_lea.vmem %s692_s23, 256 }
  0x71   : > { %509 = vmatprep.subr.bf16.mxu0 %v764_v0  ;;  %p694_p7 = scmp.lt.s32.totalorder %s982_s17, %s692_s23  ;;  %p695_p9 = scmp.lt.s32.totalorder %s693_s5, %s687_s30 }
  0x72   : > { %p690_p3 = pneg %p689_p1 }
  0x73   : > { %p696_p12 = por %p695_p9, %p694_p7 }
  0x74   : > { %511 = vmatpush3.bf16.msra.mxu0 %v510_v10 }
  0x75   : > { %512 = vmatprep.subr.bf16.mxu0 %v764_v0  ;;  %p697_p2 = pnand %p696_p12, %p690_p3 }
  0x78   : > { %514 = vmatpush3.bf16.msra.mxu0 %v513_v13 }
  0x79   : > { %515 = vmatprep.subr.bf16.mxu0 %v764_v0 }
  0x7c   : > { %517 = vmatpush3.bf16.msra.mxu0 %v516_v16 }
  0x7d   : > { %518 = vmatprep.subr.bf16.mxu0 %v764_v0 }
  0x80   : > { %520 = vmatpush3.bf16.msra.mxu0 %v519_v19 }
  0x81   : > { %521 = vmatprep.subr.bf16.mxu0 %v764_v0 }
  0x84   : > { %523 = vmatpush3.bf16.msra.mxu0 %v522_v22 }
  0x85   : > { %524 = vmatprep.subr.bf16.mxu0 %v764_v0 }
  0x88   : > { %526 = vmatpush3.bf16.msra.mxu0 %v525_v25 }
  0x8b   : > { %501 = vmatmul.mubr.f32.vlgmr.msra.gmra.mrb[0].mxu0 %v213_v26 }
 0x15e   : > { %v301_v32 = vpop.f32.mrb[0].mxu0 }
 0x15f   : > { %v302_v33 = vadd.f32 %v301_v32, %v234_v31  ;;  %v502_v34 = vpop.f32.mrb[1].mxu0 }
 0x161   : > { %v305_v35 = vadd.f32 %v302_v33, %v213_v26 }
 0x163   : > { %306 = vadd.xlane.f32.xlu0 %v305_v35 }
 0x1f0   : > { %v307_v36 = vpop.xlane.xlu0 %306 }
 0x1f1   : > { %v308_v37 = vmul.f32 0.03125, %v307_v36 }
 0x1f3   : > { %v309_v38 = vsub.f32 %v305_v35, %v308_v37  ;;  %v313_v40 = vmul.f32 96.0, %v308_v37 }
 0x1f5   : > { %v310_v39 = vmul.f32 %v309_v38, %v309_v38  ;;  %v314_v41 = vmul.f32 %v313_v40, %v308_v37 }
 0x1f7   : > { %311 = vadd.xlane.f32.xlu0 %v310_v39 }
 0x284   : > { %v312_v42 = vpop.xlane.xlu0 %311 }
 0x285   : > { %v315_v43 = vsub.f32 %v312_v42, %v314_v41 }
 0x287   : > { %v316_v44 = vmul.f32 0.03125, %v315_v43 }
 0x289   : > { %v317_v45 = vadd.f32 1e-05, %v316_v44 }
 0x28b   : > { %599 = vrsqrt.f32 %v317_v45 }
 0x295   : > { %v600_v49 = vpop.eup %599 }
 0x296   : > { %v319_v51 = vmul.f32 %v600_v49, %v309_v38 }
 0x298   : > { %v324_v52 = vmul.f32 %v323_v48, %v319_v51 }
 0x29a   : > { %v329_v53 = vadd.f32 %v328_v50, %v324_v52 }
 0x29c   : > { %331 = vst.msk [vmem:[%s212_s20] sm:$0xff] %vm330_vm1, %v329_v53 }
 0x29d   : > { %700 = shalt.err (!%p697_p2)
}
 0x29e   : > { %s701_s8 = scalar_lea.hbm %s980_s27, 128  ;;  %s705_s10 = scalar_lea.hbm %s1027_s3, 256 }
 0x29f   : > { %p702_p13 = scmp.ne.s32.totalorder %s980_s27, %s701_s8  ;;  %p706_p4 = scmp.lt.u32.totalorder %s980_s27, %s1027_s3 }
 0x2a0   : > { %p707_p5 = scmp.lt.u32.totalorder %s705_s10, %s701_s8  ;;  %p709_p11 = scmp.lt.u32.totalorder %s701_s8, %s980_s27 }
 0x2a1   : > { %p703_p6 = pnand %p702_p13, %p1041_p0 }
 0x2a2   : > { %p708_p8 = por %p707_p5, %p706_p4 }
 0x2a3   : > { %p704_p10 = pneg %p703_p6 }
 0x2a4   : > { %p710_p1 = por %p709_p11, %p708_p8 }
 0x2a6   : > { %p711_p3 = pnand %p710_p1, %p704_p10 }
 0x2a8   : > { %714 = shalt.err (!%p711_p3)
}
 0x2a9   : > { %537 = dma.vmem_to_hbm [thread:$0]  (%p1041_p0), %s982_s17, 128, %s980_s27, %s333_s29  }
 0x2aa PF: > { %s358_s28 = sand.u32 1, %s745_s12   ;;  %p1042_p7 = scmp.ne.s32.totalorder %s1032_s19, 0 }
 0x2ab   : > { %p1043_p9 = scmp.ge.s32.totalorder %s757_s15, 2  ;;  %s359_s22 = scalar_lea.sflag [#allocation4], %s358_s28 }
 0x2ad   : > { %p551_p12 = pnand %p1043_p9, %p1042_p7 }
 0x2af   : > { %740 = dma.done.wait (!%p551_p12), %s359_s22, 128  }
 0x2b0   : > { %742 = vsyncadd (!%p551_p12), %s359_s22, 4294967168  ;;  %p17_p2 = scmp.ge.s32.totalorder %s898_s4, 4   ;;  %s1044_s12 = smov %s749_s13 }
 0x2b1   : > { %s1045_s13 = smov %s753_s14  ;;  %s1046_s14 = smov %s914_s7 }
 0x2b2   : > { %s1047_s15 = smov %s898_s4  ;;  %19 = sbr.rel (!%p17_p2) target bundleno = 6 (0x6), region = 85 }
 0x2b9   :  { %364 = vsyncpa [#allocation3], 1 }
 0x2ba   :  { %366 = vsyncpa [#allocation3 + $0x1], 1 }
 0x2bb   :  { %367 = vsyncpa [#allocation6], 1 }
 0x2bc   :  { %368 = vsyncpa [#allocation4], 1 }
 0x2bd   :  { %370 = vsyncpa [#allocation4 + $0x1], 1 }

</bundles_post_ra>
